<compile_context>
chip_gen: v7x
topology: tpu7x:2x2x1
jax: 0.10.0
libtpu: 0.0.40
codegen_flags: <defaults>
</compile_context>

<pallas_src>
import functools
from collections import defaultdict

import numpy as np
import jax
import jax.numpy as jnp
from jax.experimental import pallas as pl
from jax.experimental.pallas import tpu as pltpu

F32 = jnp.float32
BF16 = jnp.bfloat16
BN_EPS = 1e-5
LANE = 128


def round_up(x, m):
    return ((x + m - 1) // m) * m


# ---------------------------------------------------------------------------
# Slab layouts (row offsets into the packed inputs)
# ---------------------------------------------------------------------------
def ops_layout(n_a, n_g, n_layers):
    r = {}
    r["A"] = 0                                   # [n_a, n_a]   A' operator
    r["M"] = n_a                                 # [n_a, n_b]   M' operator
    r["S"] = 2 * n_a                             # [n_g, n_a]   mean-pool scope
    r["maskrow"] = 2 * n_a + round_up(n_g, 8)    # row: BN count mask
    r["mask0"] = r["maskrow"] + 8                # [n_a,128] row-0/pad mask
    r["biasc"] = r["mask0"] + n_a                # [n_a,128] folded bias const
    r["gamma"] = r["biasc"] + n_a                # rows: per-layer gamma (padded)
    r["beta"] = r["gamma"] + round_up(n_layers, 8)
    r["robias"] = r["beta"] + round_up(n_layers, 8)  # rows: bo1, bo2
    r["rows"] = r["robias"] + 8
    return r


def w_layout(n_layers):
    r = {}
    r["W"] = 0                      # n_layers x [128,128] block-placed linears
    r["We"] = n_layers * LANE       # [16,128] stacked edge linears (all layers)
    r["Wo1"] = r["We"] + 16         # [128,128] readout linear 1
    r["Wo2"] = r["Wo1"] + LANE      # [128,128] readout linear 2
    r["rows"] = r["Wo2"] + LANE
    return r


# ---------------------------------------------------------------------------
# Fused Pallas kernel: 3 GIN layers + concat + mean-pool readout + 2-layer MLP
# ---------------------------------------------------------------------------
def _gin_fused_kernel(data_ref, ops_ref, w_ref, out_ref, *,
                      n_layers, n_a, n_b, n_g, edge_dim, inv_cnt, rofs, wofs):
    # ---- unpack f32 operator slab (static slices) -------------------------
    aop = ops_ref[rofs["A"]:rofs["A"] + n_a, 0:n_a]             # [N_A, N_A]
    mop = ops_ref[rofs["M"]:rofs["M"] + n_a, 0:n_b]             # [N_A, N_B]
    smat = ops_ref[rofs["S"]:rofs["S"] + n_g, 0:n_a]            # [N_G, N_A] f32
    maskrow = ops_ref[rofs["maskrow"]:rofs["maskrow"] + 8, 0:n_a][0:1, :]
    mask0 = ops_ref[rofs["mask0"]:rofs["mask0"] + n_a, :]       # [N_A, 128]
    biasc = ops_ref[rofs["biasc"]:rofs["biasc"] + n_a, :]       # [N_A, 128]
    gammas = ops_ref[rofs["gamma"]:rofs["gamma"] + 8, :]        # [8, 128]
    betas = ops_ref[rofs["beta"]:rofs["beta"] + 8, :]           # [8, 128]
    robias = ops_ref[rofs["robias"]:rofs["robias"] + 8, :]      # [8, 128]
    bo1 = robias[0:1, :]
    bo2 = robias[1:2, :]

    aop_b = aop.astype(BF16)        # 0/1/(1+eps) values: exact in bf16

    # ---- data slab ---------------------------------------------------------
    hcat = data_ref[0:n_a, :]                                   # [N_A, 128] f32
    bond = data_ref[n_a:n_a + n_b, 0:edge_dim]                  # [N_B, E]

    # ---- edge path hoisted out of the layer loop (2 matmuls for 3 layers) --
    we = w_ref[wofs["We"]:wofs["We"] + 16, :][0:edge_dim, :]    # bf16 [E, 128]
    e_all = jnp.dot(bond.astype(BF16), we, preferred_element_type=F32)
    edge_contrib = jnp.dot(mop.astype(BF16), e_all.astype(BF16),
                           preferred_element_type=F32)          # [N_A, 128]
    # per-layer bias + edge constants live in disjoint column segments
    const = biasc + edge_contrib

    # ---- GIN layers, directly on the lane-dense h_cat slab -----------------
    for l in range(n_layers):
        wl = w_ref[wofs["W"] + l * LANE: wofs["W"] + (l + 1) * LANE, :]
        x_lin = jnp.dot(hcat.astype(BF16), wl, preferred_element_type=F32)
        y = jnp.dot(aop_b, x_lin.astype(BF16),
                    preferred_element_type=F32) + const
        # BatchNorm1d training-mode batch stats (biased var, f32); the zeroed
        # padding-atom row 0 is included in the stats, matching PyTorch.
        mean = jnp.dot(maskrow, y, preferred_element_type=F32) * inv_cnt
        ex2 = jnp.dot(maskrow, y * y, preferred_element_type=F32) * inv_cnt
        var = jnp.maximum(ex2 - mean * mean, 0.0)
        ybn = (y - mean) * jax.lax.rsqrt(var + BN_EPS) * gammas[l:l + 1, :] \
              + betas[l:l + 1, :]
        # gamma/beta are zero outside this layer's column segment, so ybn is
        # exactly zero there; relu + row mask (x[0]=0, padding rows), then
        # accumulate this layer's output into its h_cat segment.
        hcat = hcat + jnp.maximum(ybn, 0.0) * mask0

    out_ref[0:n_a, :] = hcat                                     # node_repr slab

    # ---- per-graph mean pooling (f32) + readout MLP ------------------------
    gr = jnp.dot(smat, hcat, preferred_element_type=F32)         # [N_G, 128]
    out_ref[n_a:n_a + n_g, :] = gr
    wo1 = w_ref[wofs["Wo1"]:wofs["Wo1"] + LANE, :]
    wo2 = w_ref[wofs["Wo2"]:wofs["Wo2"] + LANE, :]
    h1 = jnp.maximum(
        jnp.dot(gr.astype(BF16), wo1, preferred_element_type=F32) + bo1, 0.0)
    out_ref[n_a + n_g:n_a + 2 * n_g, :] = (
        jnp.dot(h1.astype(BF16), wo2, preferred_element_type=F32) + bo2)


_VMEM = pl.BlockSpec(memory_space=pltpu.MemorySpace.VMEM)


def gin_forward(data, ops, wslab, *, n_layers, n_a, n_b, n_g, edge_dim,
                inv_cnt, rofs, wofs):
    kern = functools.partial(_gin_fused_kernel, n_layers=n_layers, n_a=n_a,
                             n_b=n_b, n_g=n_g, edge_dim=edge_dim,
                             inv_cnt=inv_cnt, rofs=rofs, wofs=wofs)
    # TODO(synk): for real workloads, batch many molecules so N_A >= 128 (block-
    # diagonal A'/M'/S) and add a parallel grid axis (megacore on v7x); one tiny
    # graph cannot fill the MXU no matter how the kernel is written.
    return pl.pallas_call(
        kern,
        out_shape=jax.ShapeDtypeStruct((n_a + 2 * n_g, LANE), F32),
        in_specs=[_VMEM, _VMEM, _VMEM],
        out_specs=_VMEM,
    )(data, ops, wslab)


# ---------------------------------------------------------------------------
# Synthetic chemprop-style graph (atom 0 / bond 0 are padding slots)
# ---------------------------------------------------------------------------
def build_graph():
    # two molecules: a 5-atom chain and a 7-atom ring
    mols = [
        (5, [(0, 1), (1, 2), (2, 3), (3, 4)]),
        (7, [(0, 1), (1, 2), (2, 3), (3, 4), (4, 5), (5, 6), (6, 0)]),
    ]
    atom_scope = []
    edges = []                                   # directed (src, dst)
    a_start = 1
    for na, el in mols:
        atom_scope.append((a_start, na))
        for (u, v) in el:
            edges.append((u + a_start, v + a_start))
            edges.append((v + a_start, u + a_start))
        a_start += na
    n_atoms = a_start
    n_bonds = len(edges) + 1
    b_from_a = np.zeros((n_bonds,), dtype=np.int64)
    incoming = defaultdict(list)
    for bi, (u, v) in enumerate(edges, start=1):
        b_from_a[bi] = u
        incoming[v].append(bi)
    max_nbrs = max(len(v) for v in incoming.values())
    a_from_b = np.zeros((n_atoms, max_nbrs), dtype=np.int64)
    for atom, blist in incoming.items():
        a_from_b[atom, :len(blist)] = blist
    a2a = b_from_a[a_from_b]
    return n_atoms, n_bonds, a_from_b, a2a, atom_scope


# ---------------------------------------------------------------------------
# Main
# ---------------------------------------------------------------------------
if __name__ == "__main__":
    node_feature_dim = 16
    edge_feature_dim = 8
    hidden_dim = 32
    layer_size = 3
    output_dim = 4
    epsilon = 0.0

    n_atoms, n_bonds, a_from_b, a2a, atom_scope = build_graph()
    n_graphs = len(atom_scope)

    N_A = round_up(n_atoms, 8)        # 16
    N_B = round_up(n_bonds, 8)        # 24
    N_G = round_up(n_graphs, 8)       # 8

    hidden_dim_list = [node_feature_dim] + [hidden_dim] * layer_size
    total_dim = sum(hidden_dim_list)                              # 112
    offsets = [int(o) for o in np.cumsum([0] + hidden_dim_list)]  # [0,16,48,80,112]
    assert total_dim <= LANE and hidden_dim <= LANE and output_dim <= LANE

    # --- graph operators (self term + row/col-0 zeroing folded in) ----------
    A_np = np.zeros((N_A, N_A), np.float32)
    M_np = np.zeros((N_A, N_B), np.float32)
    for i in range(n_atoms):
        for j in a2a[i]:
            A_np[i, j] += 1.0
        for bnd in a_from_b[i]:
            M_np[i, bnd] += 1.0
        A_np[i, i] += 1.0 + epsilon
    A_np[0, :] = 0.0; A_np[:, 0] = 0.0          # x_lin[0].fill_(0) folded in
    M_np[0, :] = 0.0; M_np[:, 0] = 0.0          # edge_message[0].fill_(0) folded in
    rowA = A_np.sum(axis=1)                     # bias multiplicity per atom
    rowM = M_np.sum(axis=1)

    S_np = np.zeros((N_G, N_A), np.float32)
    for g, (a0, asz) in enumerate(atom_scope):
        S_np[g, a0:a0 + asz] = 1.0 / asz

    maskrow_np = np.zeros((N_A,), np.float32); maskrow_np[:n_atoms] = 1.0
    mask0_np = np.zeros((N_A,), np.float32); mask0_np[1:n_atoms] = 1.0

    # --- parameters (deterministic) ------------------------------------------
    key = jax.random.PRNGKey(0)
    ks = iter(jax.random.split(key, 64))

    def init_lin(in_d, out_d):
        w = np.asarray(jax.random.normal(next(ks), (in_d, out_d), F32)) / np.sqrt(in_d)
        b = np.asarray(jax.random.normal(next(ks), (out_d,), F32)) * 0.01
        return w, b

    atom_feat = np.zeros((N_A, node_feature_dim), np.float32)
    atom_feat[:n_atoms] = np.asarray(
        jax.random.normal(next(ks), (n_atoms, node_feature_dim), F32))
    bond_feat = np.zeros((N_B, edge_feature_dim), np.float32)
    bond_feat[:n_bonds] = np.asarray(
        jax.random.normal(next(ks), (n_bonds, edge_feature_dim), F32))

    W_list, b_list, We_list, be_list = [], [], [], []
    for in_d, out_d in zip(hidden_dim_list[:-1], hidden_dim_list[1:]):
        w, b = init_lin(in_d, out_d); W_list.append(w); b_list.append(b)
        we, be = init_lin(edge_feature_dim, out_d); We_list.append(we); be_list.append(be)
    gamma_list = [np.ones((hidden_dim,), np.float32) for _ in range(layer_size)]
    beta_list = [np.zeros((hidden_dim,), np.float32) for _ in range(layer_size)]
    w1, b1 = init_lin(total_dim, hidden_dim)
    w2, b2 = init_lin(hidden_dim, output_dim)

    # --- pack the f32 operator slab ------------------------------------------
    R = ops_layout(N_A, N_G, layer_size)
    OPS = np.zeros((R["rows"], LANE), np.float32)
    OPS[R["A"]:R["A"] + N_A, :N_A] = A_np
    OPS[R["M"]:R["M"] + N_A, :N_B] = M_np
    OPS[R["S"]:R["S"] + N_G, :N_A] = S_np
    OPS[R["maskrow"], :N_A] = maskrow_np
    OPS[R["mask0"]:R["mask0"] + N_A, :] = mask0_np[:, None]
    for l in range(layer_size):
        c0 = offsets[l + 1]; c1 = offsets[l + 1] + hidden_dim_list[l + 1]
        OPS[R["biasc"]:R["biasc"] + N_A, c0:c1] = (
            rowA[:, None] * b_list[l][None, :] + rowM[:, None] * be_list[l][None, :])
        OPS[R["gamma"] + l, c0:c1] = gamma_list[l]
        OPS[R["beta"] + l, c0:c1] = beta_list[l]
    OPS[R["robias"], :hidden_dim] = b1
    OPS[R["robias"] + 1, :output_dim] = b2

    # --- pack the bf16 weight slab -------------------------------------------
    WL = w_layout(layer_size)
    WSL = np.zeros((WL["rows"], LANE), np.float32)
    for l in range(layer_size):
        in_d = hidden_dim_list[l]; out_d = hidden_dim_list[l + 1]
        r0 = WL["W"] + l * LANE
        WSL[r0 + offsets[l]: r0 + offsets[l] + in_d,
            offsets[l + 1]: offsets[l + 1] + out_d] = W_list[l]
        WSL[WL["We"]: WL["We"] + edge_feature_dim,
            offsets[l + 1]: offsets[l + 1] + out_d] = We_list[l]
    WSL[WL["Wo1"]: WL["Wo1"] + total_dim, :hidden_dim] = w1
    WSL[WL["Wo2"]: WL["Wo2"] + hidden_dim, :output_dim] = w2

    # --- pack the data slab (h_cat init with raw atom features + bond feats) --
    DATA = np.zeros((N_A + N_B, LANE), np.float32)
    DATA[:N_A, :node_feature_dim] = atom_feat
    DATA[N_A:N_A + N_B, :edge_feature_dim] = bond_feat

    data = jnp.asarray(DATA)
    ops = jnp.asarray(OPS)
    wslab = jnp.asarray(WSL, dtype=BF16)

    @jax.jit
    def forward(data, ops, wslab):
        out = gin_forward(data, ops, wslab,
                          n_layers=layer_size, n_a=N_A, n_b=N_B, n_g=N_G,
                          edge_dim=edge_feature_dim,
                          inv_cnt=1.0 / float(n_atoms), rofs=R, wofs=WL)
        return {"node_repr": out[:n_atoms, :total_dim],
                "graph_repr": out[N_A:N_A + n_graphs, :total_dim],
                "y": out[N_A + N_G:N_A + N_G + n_graphs, :output_dim]}

    result = forward(data, ops, wslab)
    jax.block_until_ready(result)
    print("KERNEL_OK")
</pallas_src>

<mosaic_0001>
module attributes {stable_mosaic.version = 11 : i64} {
  func.func @_gin_fused_kernel(%arg0: memref<40x128xf32, #tpu.memory_space<vmem>>, %arg1: memref<104x128xf32, #tpu.memory_space<vmem>>, %arg2: memref<656x128xbf16, #tpu.memory_space<vmem>>, %arg3: memref<32x128xf32, #tpu.memory_space<vmem>>) attributes {dimension_semantics = [], scalar_prefetch = 0 : i64, scratch_operands = 0 : i64, tpu.core_type = #tpu.core_type<tc>} {
    %c0 = arith.constant 0 : index
    %c0_0 = arith.constant 0 : index
    %0 = vector.load %arg1[%c0, %c0_0] : memref<104x128xf32, #tpu.memory_space<vmem>>, vector<16x16xf32>
    %c16 = arith.constant 16 : index
    %c0_1 = arith.constant 0 : index
    %1 = vector.load %arg1[%c16, %c0_1] : memref<104x128xf32, #tpu.memory_space<vmem>>, vector<16x24xf32>
    %c32 = arith.constant 32 : index
    %c0_2 = arith.constant 0 : index
    %2 = vector.load %arg1[%c32, %c0_2] : memref<104x128xf32, #tpu.memory_space<vmem>>, vector<8x16xf32>
    %c40 = arith.constant 40 : index
    %c0_3 = arith.constant 0 : index
    %3 = vector.load %arg1[%c40, %c0_3] : memref<104x128xf32, #tpu.memory_space<vmem>>, vector<8x16xf32>
    %4 = vector.extract_strided_slice %3 {offsets = [0, 0], sizes = [1, 16], strides = [1, 1]} : vector<8x16xf32> to vector<1x16xf32>
    %c48 = arith.constant 48 : index
    %c0_4 = arith.constant 0 : index
    %5 = vector.load %arg1[%c48, %c0_4] : memref<104x128xf32, #tpu.memory_space<vmem>>, vector<16x128xf32>
    %c64 = arith.constant 64 : index
    %c0_5 = arith.constant 0 : index
    %6 = vector.load %arg1[%c64, %c0_5] : memref<104x128xf32, #tpu.memory_space<vmem>>, vector<16x128xf32>
    %c80 = arith.constant 80 : index
    %c0_6 = arith.constant 0 : index
    %7 = vector.load %arg1[%c80, %c0_6] : memref<104x128xf32, #tpu.memory_space<vmem>>, vector<8x128xf32>
    %c88 = arith.constant 88 : index
    %c0_7 = arith.constant 0 : index
    %8 = vector.load %arg1[%c88, %c0_7] : memref<104x128xf32, #tpu.memory_space<vmem>>, vector<8x128xf32>
    %c96 = arith.constant 96 : index
    %c0_8 = arith.constant 0 : index
    %9 = vector.load %arg1[%c96, %c0_8] : memref<104x128xf32, #tpu.memory_space<vmem>>, vector<8x128xf32>
    %10 = vector.extract_strided_slice %9 {offsets = [0, 0], sizes = [1, 128], strides = [1, 1]} : vector<8x128xf32> to vector<1x128xf32>
    %11 = vector.extract_strided_slice %9 {offsets = [1, 0], sizes = [1, 128], strides = [1, 1]} : vector<8x128xf32> to vector<1x128xf32>
    %12 = arith.truncf %0 : vector<16x16xf32> to vector<16x16xbf16>
    %c0_9 = arith.constant 0 : index
    %c0_10 = arith.constant 0 : index
    %13 = vector.load %arg0[%c0_9, %c0_10] : memref<40x128xf32, #tpu.memory_space<vmem>>, vector<16x128xf32>
    %c16_11 = arith.constant 16 : index
    %c0_12 = arith.constant 0 : index
    %14 = vector.load %arg0[%c16_11, %c0_12] : memref<40x128xf32, #tpu.memory_space<vmem>>, vector<24x8xf32>
    %c384 = arith.constant 384 : index
    %c0_13 = arith.constant 0 : index
    %15 = vector.load %arg2[%c384, %c0_13] : memref<656x128xbf16, #tpu.memory_space<vmem>>, vector<16x128xbf16>
    %16 = vector.extract_strided_slice %15 {offsets = [0, 0], sizes = [8, 128], strides = [1, 1]} : vector<16x128xbf16> to vector<8x128xbf16>
    %17 = arith.truncf %14 : vector<24x8xf32> to vector<24x8xbf16>
    %cst = arith.constant dense<0.000000e+00> : vector<24x128xf32>
    %18 = tpu.matmul %17, %16, %cst {dimension_numbers = #tpu.dot_dimension_numbers<[1], [0], [0], [1], [0, 0, 1, 1], [], []>} : vector<24x8xbf16>, vector<8x128xbf16>, vector<24x128xf32> -> vector<24x128xf32>
    %19 = arith.truncf %1 : vector<16x24xf32> to vector<16x24xbf16>
    %20 = arith.truncf %18 : vector<24x128xf32> to vector<24x128xbf16>
    %cst_14 = arith.constant dense<0.000000e+00> : vector<16x128xf32>
    %21 = tpu.matmul %19, %20, %cst_14 {dimension_numbers = #tpu.dot_dimension_numbers<[1], [0], [0], [1], [0, 0, 1, 1], [], []>} : vector<16x24xbf16>, vector<24x128xbf16>, vector<16x128xf32> -> vector<16x128xf32>
    %22 = arith.addf %6, %21 : vector<16x128xf32>
    %c0_15 = arith.constant 0 : index
    %c0_16 = arith.constant 0 : index
    %23 = vector.load %arg2[%c0_15, %c0_16] : memref<656x128xbf16, #tpu.memory_space<vmem>>, vector<128x128xbf16>
    %24 = arith.truncf %13 : vector<16x128xf32> to vector<16x128xbf16>
    %cst_17 = arith.constant dense<0.000000e+00> : vector<16x128xf32>
    %25 = tpu.matmul %24, %23, %cst_17 {dimension_numbers = #tpu.dot_dimension_numbers<[1], [0], [0], [1], [0, 0, 1, 1], [], []>} : vector<16x128xbf16>, vector<128x128xbf16>, vector<16x128xf32> -> vector<16x128xf32>
    %26 = arith.truncf %25 : vector<16x128xf32> to vector<16x128xbf16>
    %cst_18 = arith.constant dense<0.000000e+00> : vector<16x128xf32>
    %27 = tpu.matmul %12, %26, %cst_18 {dimension_numbers = #tpu.dot_dimension_numbers<[1], [0], [0], [1], [0, 0, 1, 1], [], []>} : vector<16x16xbf16>, vector<16x128xbf16>, vector<16x128xf32> -> vector<16x128xf32>
    %28 = arith.addf %27, %22 : vector<16x128xf32>
    %cst_19 = arith.constant dense<0.000000e+00> : vector<1x128xf32>
    %29 = tpu.matmul %4, %28, %cst_19 {dimension_numbers = #tpu.dot_dimension_numbers<[1], [0], [0], [1], [0, 0, 1, 1], [], []>} : vector<1x16xf32>, vector<16x128xf32>, vector<1x128xf32> -> vector<1x128xf32>
    %cst_20 = arith.constant 0.0769230798 : f32
    %30 = vector.broadcast %cst_20 : f32 to vector<1x128xf32>
    %31 = arith.mulf %29, %30 : vector<1x128xf32>
    %32 = arith.mulf %28, %28 : vector<16x128xf32>
    %cst_21 = arith.constant dense<0.000000e+00> : vector<1x128xf32>
    %33 = tpu.matmul %4, %32, %cst_21 {dimension_numbers = #tpu.dot_dimension_numbers<[1], [0], [0], [1], [0, 0, 1, 1], [], []>} : vector<1x16xf32>, vector<16x128xf32>, vector<1x128xf32> -> vector<1x128xf32>
    %cst_22 = arith.constant 0.0769230798 : f32
    %34 = vector.broadcast %cst_22 : f32 to vector<1x128xf32>
    %35 = arith.mulf %33, %34 : vector<1x128xf32>
    %36 = arith.mulf %31, %31 : vector<1x128xf32>
    %37 = arith.subf %35, %36 : vector<1x128xf32>
    %cst_23 = arith.constant 0.000000e+00 : f32
    %38 = vector.broadcast %cst_23 : f32 to vector<1x128xf32>
    %39 = arith.maximumf %37, %38 : vector<1x128xf32>
    %40 = vector.broadcast %31 : vector<1x128xf32> to vector<16x128xf32>
    %41 = arith.subf %28, %40 : vector<16x128xf32>
    %cst_24 = arith.constant 9.99999974E-6 : f32
    %42 = vector.broadcast %cst_24 : f32 to vector<1x128xf32>
    %43 = arith.addf %39, %42 : vector<1x128xf32>
    %44 = math.rsqrt %43 : vector<1x128xf32>
    %45 = vector.broadcast %44 : vector<1x128xf32> to vector<16x128xf32>
    %46 = arith.mulf %41, %45 : vector<16x128xf32>
    %47 = vector.extract_strided_slice %7 {offsets = [0, 0], sizes = [1, 128], strides = [1, 1]} : vector<8x128xf32> to vector<1x128xf32>
    %48 = vector.broadcast %47 : vector<1x128xf32> to vector<16x128xf32>
    %49 = arith.mulf %46, %48 : vector<16x128xf32>
    %50 = vector.extract_strided_slice %8 {offsets = [0, 0], sizes = [1, 128], strides = [1, 1]} : vector<8x128xf32> to vector<1x128xf32>
    %51 = vector.broadcast %50 : vector<1x128xf32> to vector<16x128xf32>
    %52 = arith.addf %49, %51 : vector<16x128xf32>
    %cst_25 = arith.constant 0.000000e+00 : f32
    %53 = vector.broadcast %cst_25 : f32 to vector<16x128xf32>
    %54 = arith.maximumf %52, %53 : vector<16x128xf32>
    %55 = arith.mulf %54, %5 : vector<16x128xf32>
    %56 = arith.addf %13, %55 : vector<16x128xf32>
    %c128 = arith.constant 128 : index
    %c0_26 = arith.constant 0 : index
    %57 = vector.load %arg2[%c128, %c0_26] : memref<656x128xbf16, #tpu.memory_space<vmem>>, vector<128x128xbf16>
    %58 = arith.truncf %56 : vector<16x128xf32> to vector<16x128xbf16>
    %cst_27 = arith.constant dense<0.000000e+00> : vector<16x128xf32>
    %59 = tpu.matmul %58, %57, %cst_27 {dimension_numbers = #tpu.dot_dimension_numbers<[1], [0], [0], [1], [0, 0, 1, 1], [], []>} : vector<16x128xbf16>, vector<128x128xbf16>, vector<16x128xf32> -> vector<16x128xf32>
    %60 = arith.truncf %59 : vector<16x128xf32> to vector<16x128xbf16>
    %cst_28 = arith.constant dense<0.000000e+00> : vector<16x128xf32>
    %61 = tpu.matmul %12, %60, %cst_28 {dimension_numbers = #tpu.dot_dimension_numbers<[1], [0], [0], [1], [0, 0, 1, 1], [], []>} : vector<16x16xbf16>, vector<16x128xbf16>, vector<16x128xf32> -> vector<16x128xf32>
    %62 = arith.addf %61, %22 : vector<16x128xf32>
    %cst_29 = arith.constant dense<0.000000e+00> : vector<1x128xf32>
    %63 = tpu.matmul %4, %62, %cst_29 {dimension_numbers = #tpu.dot_dimension_numbers<[1], [0], [0], [1], [0, 0, 1, 1], [], []>} : vector<1x16xf32>, vector<16x128xf32>, vector<1x128xf32> -> vector<1x128xf32>
    %cst_30 = arith.constant 0.0769230798 : f32
    %64 = vector.broadcast %cst_30 : f32 to vector<1x128xf32>
    %65 = arith.mulf %63, %64 : vector<1x128xf32>
    %66 = arith.mulf %62, %62 : vector<16x128xf32>
    %cst_31 = arith.constant dense<0.000000e+00> : vector<1x128xf32>
    %67 = tpu.matmul %4, %66, %cst_31 {dimension_numbers = #tpu.dot_dimension_numbers<[1], [0], [0], [1], [0, 0, 1, 1], [], []>} : vector<1x16xf32>, vector<16x128xf32>, vector<1x128xf32> -> vector<1x128xf32>
    %cst_32 = arith.constant 0.0769230798 : f32
    %68 = vector.broadcast %cst_32 : f32 to vector<1x128xf32>
    %69 = arith.mulf %67, %68 : vector<1x128xf32>
    %70 = arith.mulf %65, %65 : vector<1x128xf32>
    %71 = arith.subf %69, %70 : vector<1x128xf32>
    %cst_33 = arith.constant 0.000000e+00 : f32
    %72 = vector.broadcast %cst_33 : f32 to vector<1x128xf32>
    %73 = arith.maximumf %71, %72 : vector<1x128xf32>
    %74 = vector.broadcast %65 : vector<1x128xf32> to vector<16x128xf32>
    %75 = arith.subf %62, %74 : vector<16x128xf32>
    %cst_34 = arith.constant 9.99999974E-6 : f32
    %76 = vector.broadcast %cst_34 : f32 to vector<1x128xf32>
    %77 = arith.addf %73, %76 : vector<1x128xf32>
    %78 = math.rsqrt %77 : vector<1x128xf32>
    %79 = vector.broadcast %78 : vector<1x128xf32> to vector<16x128xf32>
    %80 = arith.mulf %75, %79 : vector<16x128xf32>
    %81 = vector.extract_strided_slice %7 {offsets = [1, 0], sizes = [1, 128], strides = [1, 1]} : vector<8x128xf32> to vector<1x128xf32>
    %82 = vector.broadcast %81 : vector<1x128xf32> to vector<16x128xf32>
    %83 = arith.mulf %80, %82 : vector<16x128xf32>
    %84 = vector.extract_strided_slice %8 {offsets = [1, 0], sizes = [1, 128], strides = [1, 1]} : vector<8x128xf32> to vector<1x128xf32>
    %85 = vector.broadcast %84 : vector<1x128xf32> to vector<16x128xf32>
    %86 = arith.addf %83, %85 : vector<16x128xf32>
    %cst_35 = arith.constant 0.000000e+00 : f32
    %87 = vector.broadcast %cst_35 : f32 to vector<16x128xf32>
    %88 = arith.maximumf %86, %87 : vector<16x128xf32>
    %89 = arith.mulf %88, %5 : vector<16x128xf32>
    %90 = arith.addf %56, %89 : vector<16x128xf32>
    %c256 = arith.constant 256 : index
    %c0_36 = arith.constant 0 : index
    %91 = vector.load %arg2[%c256, %c0_36] : memref<656x128xbf16, #tpu.memory_space<vmem>>, vector<128x128xbf16>
    %92 = arith.truncf %90 : vector<16x128xf32> to vector<16x128xbf16>
    %cst_37 = arith.constant dense<0.000000e+00> : vector<16x128xf32>
    %93 = tpu.matmul %92, %91, %cst_37 {dimension_numbers = #tpu.dot_dimension_numbers<[1], [0], [0], [1], [0, 0, 1, 1], [], []>} : vector<16x128xbf16>, vector<128x128xbf16>, vector<16x128xf32> -> vector<16x128xf32>
    %94 = arith.truncf %93 : vector<16x128xf32> to vector<16x128xbf16>
    %cst_38 = arith.constant dense<0.000000e+00> : vector<16x128xf32>
    %95 = tpu.matmul %12, %94, %cst_38 {dimension_numbers = #tpu.dot_dimension_numbers<[1], [0], [0], [1], [0, 0, 1, 1], [], []>} : vector<16x16xbf16>, vector<16x128xbf16>, vector<16x128xf32> -> vector<16x128xf32>
    %96 = arith.addf %95, %22 : vector<16x128xf32>
    %cst_39 = arith.constant dense<0.000000e+00> : vector<1x128xf32>
    %97 = tpu.matmul %4, %96, %cst_39 {dimension_numbers = #tpu.dot_dimension_numbers<[1], [0], [0], [1], [0, 0, 1, 1], [], []>} : vector<1x16xf32>, vector<16x128xf32>, vector<1x128xf32> -> vector<1x128xf32>
    %cst_40 = arith.constant 0.0769230798 : f32
    %98 = vector.broadcast %cst_40 : f32 to vector<1x128xf32>
    %99 = arith.mulf %97, %98 : vector<1x128xf32>
    %100 = arith.mulf %96, %96 : vector<16x128xf32>
    %cst_41 = arith.constant dense<0.000000e+00> : vector<1x128xf32>
    %101 = tpu.matmul %4, %100, %cst_41 {dimension_numbers = #tpu.dot_dimension_numbers<[1], [0], [0], [1], [0, 0, 1, 1], [], []>} : vector<1x16xf32>, vector<16x128xf32>, vector<1x128xf32> -> vector<1x128xf32>
    %cst_42 = arith.constant 0.0769230798 : f32
    %102 = vector.broadcast %cst_42 : f32 to vector<1x128xf32>
    %103 = arith.mulf %101, %102 : vector<1x128xf32>
    %104 = arith.mulf %99, %99 : vector<1x128xf32>
    %105 = arith.subf %103, %104 : vector<1x128xf32>
    %cst_43 = arith.constant 0.000000e+00 : f32
    %106 = vector.broadcast %cst_43 : f32 to vector<1x128xf32>
    %107 = arith.maximumf %105, %106 : vector<1x128xf32>
    %108 = vector.broadcast %99 : vector<1x128xf32> to vector<16x128xf32>
    %109 = arith.subf %96, %108 : vector<16x128xf32>
    %cst_44 = arith.constant 9.99999974E-6 : f32
    %110 = vector.broadcast %cst_44 : f32 to vector<1x128xf32>
    %111 = arith.addf %107, %110 : vector<1x128xf32>
    %112 = math.rsqrt %111 : vector<1x128xf32>
    %113 = vector.broadcast %112 : vector<1x128xf32> to vector<16x128xf32>
    %114 = arith.mulf %109, %113 : vector<16x128xf32>
    %115 = vector.extract_strided_slice %7 {offsets = [2, 0], sizes = [1, 128], strides = [1, 1]} : vector<8x128xf32> to vector<1x128xf32>
    %116 = vector.broadcast %115 : vector<1x128xf32> to vector<16x128xf32>
    %117 = arith.mulf %114, %116 : vector<16x128xf32>
    %118 = vector.extract_strided_slice %8 {offsets = [2, 0], sizes = [1, 128], strides = [1, 1]} : vector<8x128xf32> to vector<1x128xf32>
    %119 = vector.broadcast %118 : vector<1x128xf32> to vector<16x128xf32>
    %120 = arith.addf %117, %119 : vector<16x128xf32>
    %cst_45 = arith.constant 0.000000e+00 : f32
    %121 = vector.broadcast %cst_45 : f32 to vector<16x128xf32>
    %122 = arith.maximumf %120, %121 : vector<16x128xf32>
    %123 = arith.mulf %122, %5 : vector<16x128xf32>
    %124 = arith.addf %90, %123 : vector<16x128xf32>
    %c0_46 = arith.constant 0 : index
    %c0_47 = arith.constant 0 : index
    %125 = vector.load %arg3[%c0_46, %c0_47] : memref<32x128xf32, #tpu.memory_space<vmem>>, vector<16x128xf32>
    tpu.vector_store %arg3[%c0_46, %c0_47], %124 {strides = array<i32>} : memref<32x128xf32, #tpu.memory_space<vmem>>, vector<16x128xf32>,
    %cst_48 = arith.constant dense<0.000000e+00> : vector<8x128xf32>
    %126 = tpu.matmul %2, %124, %cst_48 {dimension_numbers = #tpu.dot_dimension_numbers<[1], [0], [0], [1], [0, 0, 1, 1], [], []>} : vector<8x16xf32>, vector<16x128xf32>, vector<8x128xf32> -> vector<8x128xf32>
    %c16_49 = arith.constant 16 : index
    %c0_50 = arith.constant 0 : index
    %127 = vector.load %arg3[%c16_49, %c0_50] : memref<32x128xf32, #tpu.memory_space<vmem>>, vector<8x128xf32>
    tpu.vector_store %arg3[%c16_49, %c0_50], %126 {strides = array<i32>} : memref<32x128xf32, #tpu.memory_space<vmem>>, vector<8x128xf32>,
    %c400 = arith.constant 400 : index
    %c0_51 = arith.constant 0 : index
    %128 = vector.load %arg2[%c400, %c0_51] : memref<656x128xbf16, #tpu.memory_space<vmem>>, vector<128x128xbf16>
    %c528 = arith.constant 528 : index
    %c0_52 = arith.constant 0 : index
    %129 = vector.load %arg2[%c528, %c0_52] : memref<656x128xbf16, #tpu.memory_space<vmem>>, vector<128x128xbf16>
    %130 = arith.truncf %126 : vector<8x128xf32> to vector<8x128xbf16>
    %cst_53 = arith.constant dense<0.000000e+00> : vector<8x128xf32>
    %131 = tpu.matmul %130, %128, %cst_53 {dimension_numbers = #tpu.dot_dimension_numbers<[1], [0], [0], [1], [0, 0, 1, 1], [], []>} : vector<8x128xbf16>, vector<128x128xbf16>, vector<8x128xf32> -> vector<8x128xf32>
    %132 = vector.broadcast %10 : vector<1x128xf32> to vector<8x128xf32>
    %133 = arith.addf %131, %132 : vector<8x128xf32>
    %cst_54 = arith.constant 0.000000e+00 : f32
    %134 = vector.broadcast %cst_54 : f32 to vector<8x128xf32>
    %135 = arith.maximumf %133, %134 : vector<8x128xf32>
    %136 = arith.truncf %135 : vector<8x128xf32> to vector<8x128xbf16>
    %cst_55 = arith.constant dense<0.000000e+00> : vector<8x128xf32>
    %137 = tpu.matmul %136, %129, %cst_55 {dimension_numbers = #tpu.dot_dimension_numbers<[1], [0], [0], [1], [0, 0, 1, 1], [], []>} : vector<8x128xbf16>, vector<128x128xbf16>, vector<8x128xf32> -> vector<8x128xf32>
    %138 = vector.broadcast %11 : vector<1x128xf32> to vector<8x128xf32>
    %139 = arith.addf %137, %138 : vector<8x128xf32>
    %c24 = arith.constant 24 : index
    %c0_56 = arith.constant 0 : index
    %140 = vector.load %arg3[%c24, %c0_56] : memref<32x128xf32, #tpu.memory_space<vmem>>, vector<8x128xf32>
    tpu.vector_store %arg3[%c24, %c0_56], %139 {strides = array<i32>} : memref<32x128xf32, #tpu.memory_space<vmem>>, vector<8x128xf32>,
    return
  }
}

</mosaic_0001>

<bundles_post_ra>
// kernel: forward.1
= control target key start
LH: loop header
LB: loop body
LE: loop exit
PB: predicated region body
PF: predicated region fallthrough
CT: control target
= control target key end

     0   :  { %8 = vsyncpa [#allocation3], 0  ;;  %s2214_s0 = inlined_call_operand.hbm [shape: f32[40,128], index: 0, kind: input, shape index: {}]   ;;  %s2215_s1 = inlined_call_operand.hbm [shape: f32[104,128], index: 1, kind: input, shape index: {}]   ;;  %s2216_s2 = inlined_call_operand.hbm [shape: bf16[656,128], index: 2, kind: input, shape index: {}]   ;;  %s2217_s3 = inlined_call_operand.vmem [shape: f32[32,128], index: 3, kind: output, shape index: {}]  }
   0x1   :  { %9 = vsyncpa [#allocation5], 0  ;;  %s1940_s12 = smov [#allocation4]   ;;  %s1941_s14 = smov [#allocation2]  }
   0x2   :  { %s27_s13 = sshll.u32 %s1940_s12, 4  ;;  %s15_s15 = sshll.u32 %s1941_s14, 4  ;;  %s28_s13 = int_to_ptr.vmem [resolvable:$true] %s27_s13  ;;  %s1970_s15 = int_to_ptr.vmem [resolvable:$true] %s15_s15 }
   0x3   :  { %s1870_s18 = scalar_lea.hbm %s2215_s1, 1664 }
   0x4   :  { %p1871_p0 = scmp.ne.s32.totalorder %s2215_s1, %s1870_s18  ;;  %p1874_p1 = scmp.lt.u32.totalorder %s1870_s18, %s2215_s1 }
   0x6   :  { %p1876_p2 = pnand %p1874_p1, %p1871_p0 }
   0x8   :  { %1879 = shalt.err (!%p1876_p2)
}
   0x9   :  { %s1880_s23 = scalar_lea.vmem %s28_s13, 1664  ;;  %p1885_p4 = scmp.lt.s32.totalorder %s28_s13, %s28_s13 }
   0xa   :  { %p1881_p3 = scmp.ne.s32.totalorder %s28_s13, %s1880_s23  ;;  %p1886_p5 = scmp.lt.s32.totalorder %s1880_s23, %s1880_s23 }
   0xc   :  { %p1887_p6 = por %p1886_p5, %p1885_p4 }
   0xe   :  { %p1888_p7 = pnand %p1887_p6, %p1881_p3 }
  0x10   :  { %1891 = shalt.err (!%p1888_p7)
}
  0x11   :  { %s1942_s24 = smov 128   ;;  %s1943_s25 = smov 8  }
  0x12   :  { %33 = dma.hbm_to_vmem [thread:$0]  %s2215_s1, 1664, %s28_s13, [#allocation5], %s1942_s24, %s1942_s24, %s1943_s25  }
  0x13   :  { %s1892_s30 = scalar_lea.hbm %s2214_s0, 640 }
  0x14   :  { %p1893_p8 = scmp.ne.s32.totalorder %s2214_s0, %s1892_s30  ;;  %p1896_p9 = scmp.lt.u32.totalorder %s1892_s30, %s2214_s0 }
  0x16   :  { %p1898_p10 = pnand %p1896_p9, %p1893_p8 }
  0x18   :  { %1901 = shalt.err (!%p1898_p10)
}
  0x19   :  { %s1902_s8 = scalar_lea.vmem %s1970_s15, 640  ;;  %p1907_p12 = scmp.lt.s32.totalorder %s1970_s15, %s1970_s15 }
  0x1a   :  { %p1903_p11 = scmp.ne.s32.totalorder %s1970_s15, %s1902_s8  ;;  %p1908_p13 = scmp.lt.s32.totalorder %s1902_s8, %s1902_s8 }
  0x1c   :  { %p1909_p0 = por %p1908_p13, %p1907_p12 }
  0x1e   :  { %p1910_p1 = pnand %p1909_p0, %p1903_p11 }
  0x20   :  { %1913 = shalt.err (!%p1910_p1)
}
  0x21   :  { %21 = dma.hbm_to_vmem [thread:$0]  %s2214_s0, 640, %s1970_s15, [#allocation3], %s1942_s24, %s1942_s24, %s1943_s25  }
  0x22   :  { %s1944_s10 = smov [#allocation6]   ;;  %s1914_s14 = scalar_lea.hbm %s2216_s2, 5248 }
  0x23   :  { %s39_s11 = sshll.u32 %s1944_s10, 4  ;;  %p1915_p2 = scmp.ne.s32.totalorder %s2216_s2, %s1914_s14  ;;  %s40_s11 = int_to_ptr.vmem [resolvable:$true] %s39_s11 }
  0x24   :  { %p1918_p3 = scmp.lt.u32.totalorder %s1914_s14, %s2216_s2 }
  0x26   :  { %p1920_p4 = pnand %p1918_p3, %p1915_p2 }
  0x28   :  { %1923 = shalt.err (!%p1920_p4)
}
  0x29   :  { %s1924_s20 = scalar_lea.vmem %s40_s11, 5248  ;;  %p1929_p6 = scmp.lt.s32.totalorder %s40_s11, %s40_s11 }
  0x2a   :  { %p1925_p5 = scmp.ne.s32.totalorder %s40_s11, %s1924_s20  ;;  %p1930_p7 = scmp.lt.s32.totalorder %s1924_s20, %s1924_s20 }
  0x2c   :  { %p1931_p8 = por %p1930_p7, %p1929_p6 }
  0x2e   :  { %p1932_p9 = pnand %p1931_p8, %p1925_p5 }
  0x30   :  { %1935 = shalt.err (!%p1932_p9)
}
  0x31   :  { %s1945_s0 = smov 64   ;;  %s1946_s15 = smov 4  }
  0x32   :  { %45 = dma.hbm_to_vmem [thread:$0]  %s2216_s2, 5248, %s40_s11, [#allocation5], %s1945_s0, %s1945_s0, %s1946_s15  }
  0x33   :  { %1936 = dma.done.wait [#allocation3], 640  }
  0x34   :  { %1937 = vsyncadd [#allocation3], 4294966656 }
  0x35   :  { %1938 = dma.done.wait [#allocation5], 6912  }
  0x36   :  { %1939 = vsyncadd [#allocation5], 4294960384  ;;  %v1947_v0 = vmov 0.0   ;;  %vm1948_vm0 = vmmov 0   ;;  %vm85_vm1 = vcmask 1043456   ;;  %v72_v2 = vld [vmem:[#allocation2 + $0x10] sm:$0xff] }
  0x37   :  { %1617 = vmatprep.subr.bf16.mxu1 %v1947_v0  ;;  %1621 = vmatprep.mubr.msk.bf16.mxu1 %vm1948_vm0, %v1947_v0  ;;  %v75_v1 = vld [vmem:[#allocation6 + $0xc0] sm:$0xf]  ;;  %v73_v3 = vld [vmem:[#allocation2 + $0x18] sm:$0xff]  ;;  %vm78_vm2 = vcmask 64512   ;;  %v74_v6 = vld [vmem:[#allocation2 + $0x20] sm:$0xff]  ;;  %vm140_vm3 = vcmask 195584  }
  0x38   :  { %1813 = vmatprep.subr.msk.bf16.mxu0 %vm85_vm1, %v75_v1  ;;  %v87_v4 = vsel %vm85_vm1, %v75_v1, 0  ;;  %v76_v5 = vpack.c.bf16 %v73_v3, %v72_v2  ;;  %v77_v7 = vpack.c.bf16 %v74_v6, %v74_v6  ;;  %v1824_v8 = vld [vmem:[#allocation6] sm:$0xff]   ;;  %v1825_v9 = vld [vmem:[#allocation6 + $0x8] sm:$0xff]   ;;  %v1826_v10 = vld [vmem:[#allocation6 + $0x10] sm:$0xff]   ;;  %vm297_vm4 = vcmask 130048  }
  0x39   :  { %1612 = vmatpush3.bf16.msra.mxu0 %v87_v4  ;;  %v1827_v11 = vld [vmem:[#allocation6 + $0x18] sm:$0xff]   ;;  %v1828_v12 = vld [vmem:[#allocation6 + $0x20] sm:$0xff]   ;;  %v1829_v13 = vld [vmem:[#allocation6 + $0x28] sm:$0xff]   ;;  %v1949_v37 = vmov 0.0|0.0  }
  0x3a   :  { %1613 = vmatprep.mubr.msk.bf16.mxu0 %vm78_vm2, %v76_v5  ;;  %1625 = vmatprep.subr.bf16.mxu0 %v1947_v0  ;;  %v1830_v14 = vld [vmem:[#allocation6 + $0x30] sm:$0xff]   ;;  %v1831_v15 = vld [vmem:[#allocation6 + $0x38] sm:$0xff]   ;;  %v58_v25 = vld [vmem:[#allocation4 + $0x10] sm:$0xff] }
  0x3b   :  { %v2027_v16 = vld [vmem:[#allocation2] sm:$0xff]  ;;  %v2029_v17 = vld [vmem:[#allocation2 + $0x8] sm:$0xff]  ;;  %v57_v32 = vld [vmem:[#allocation4 + $0x8] sm:$0xff] }
  0x3c   :  { %1614 = vmatmul.mubr.msk.bf16.vlgmr.msra.gmra.mrb[0].mxu0 %vm78_vm2, %v77_v7  ;;  %v206_v18 = vpack.c.bf16 %v2029_v17, %v2027_v16  ;;  %v59_v26 = vld [vmem:[#allocation4 + $0x18] sm:$0xff]  ;;  %v56_v31 = vld [vmem:[#allocation4] sm:$0xff]  ;;  %v65_v43 = vld [vmem:[#allocation4 + $0x48] sm:$0xff] }
  0x3d   :  { %1626 = vmatpush3.bf16.msra.mxu0 %v1824_v8  ;;  %1641 = vmatprep.mubr.msk.bf16.mxu0 %vm1948_vm0, %v1947_v0  ;;  %v137_v28 = vpack.c.bf16 %v59_v26, %v58_v25  ;;  %v2042_v36 = vpack.c.bf16 %v57_v32, %v56_v31  ;;  %v64_v42 = vld [vmem:[#allocation4 + $0x40] sm:$0xff]  ;;  %v2065_v55 = vld [vmem:[#allocation4 + $0x28] sm:$0xff]  ;;  %v1833_v58 = vld [vmem:[#allocation6 + $0x48] sm:$0xff]  }
  0x3e   :  { %1627 = vmatprep.subr.bf16.mxu0 %v1947_v0  ;;  %v1832_v57 = vld [vmem:[#allocation6 + $0x40] sm:$0xff]   ;;  %v1834_v59 = vld [vmem:[#allocation6 + $0x50] sm:$0xff]   ;;  %v1835_v60 = vld [vmem:[#allocation6 + $0x58] sm:$0xff]  }
  0x3f   :  { %v1836_v61 = vld [vmem:[#allocation6 + $0x60] sm:$0xff]   ;;  %v1837_v62 = vld [vmem:[#allocation6 + $0x68] sm:$0xff]   ;;  %v1838_v63 = vld [vmem:[#allocation6 + $0x70] sm:$0xff]  }
  0x40   :  { %v1839_v1 = vld [vmem:[#allocation6 + $0x78] sm:$0xff]   ;;  %v2102_v32 = vld [vmem:[#allocation4 + $0x30] sm:$0xff] }
  0x41   :  { %1628 = vmatpush3.bf16.msra.mxu0 %v1825_v9 }
  0x42   :  { %1629 = vmatprep.subr.bf16.mxu0 %v1947_v0 }
  0x45   :  { %1630 = vmatpush3.bf16.msra.mxu0 %v1826_v10  ;;  %v492_v10 = vlaneseq }
  0x46   :  { %1631 = vmatprep.subr.bf16.mxu0 %v1947_v0 }
  0x49   :  { %1632 = vmatpush3.bf16.msra.mxu0 %v1827_v11 }
  0x4a   :  { %1633 = vmatprep.subr.bf16.mxu0 %v1947_v0 }
  0x4d   :  { %1634 = vmatpush3.bf16.msra.mxu0 %v1828_v12 }
  0x4e   :  { %1635 = vmatprep.subr.bf16.mxu0 %v1947_v0 }
  0x51   :  { %1636 = vmatpush3.bf16.msra.mxu0 %v1829_v13  ;;  %v2085_v13 = vshrl.u32 %v492_v10, 7 }
  0x52   :  { %1637 = vmatprep.subr.bf16.mxu0 %v1947_v0 }
  0x55   :  { %1638 = vmatpush3.bf16.msra.mxu0 %v1830_v14  ;;  %v2088_v14 = vsub.s32 0, %v2085_v13 }
  0x56   :  { %1639 = vmatprep.subr.bf16.mxu0 %v1947_v0 }
  0x59   :  { %1640 = vmatpush3.bf16.msra.mxu0 %v1831_v15 }
  0x5a   :  { %1685 = vmatprep.subr.bf16.mxu0 %v1947_v0 }
  0x5c   :  { %1642 = vmatmul.mubr.bf16.vlgmr.msra.gmra.mrb[4].mxu0 %v206_v18  ;;  %v2091_v18 = vld [vmem:[#allocation4 + $0x50] sm:$0xff] }
  0x5d   :  { %1687 = vmatprep.mubr.msk.bf16.mxu0 %vm1948_vm0, %v1947_v0 }
 0x10f   :  { %v1615_v19 = vpop.f32.mrb[0].mxu0 }
 0x110   :  { %v123_v20 = vpop.f32.mrb[1].mxu0  ;;  %v139_v24 = vpack.c.bf16 %v1615_v19, %v1615_v19 }
 0x111   :  { %v1616_v21 = vpop.f32.mrb[2].mxu0 }
 0x112   :  { %v126_v22 = vpop.f32.mrb[3].mxu0  ;;  %v145_v27 = vsel %vm85_vm1, %v139_v24, 0  ;;  %v509_v24 = vrot.slane %v2091_v18, %v2088_v14 }
 0x113   :  { %v138_v23 = vpack.c.bf16 %v126_v22, %v123_v20  ;;  %v2093_v20 = vld [vmem:[#allocation4 + $0x58] sm:$0xff] }
 0x115   :  { %1618 = vmatpush3.bf16.msra.mxu1 %v138_v23 }
 0x116   :  { %1619 = vmatprep.subr.bf16.mxu1 %v1947_v0 }
 0x119   :  { %1620 = vmatpush3.bf16.msra.mxu1 %v145_v27  ;;  %v515_v27 = vrot.slane %v2093_v20, %v2088_v14 }
 0x11a   :  { %1645 = vmatprep.subr.bf16.mxu1 %v1947_v0 }
 0x11c   :  { %1622 = vmatmul.mubr.msk.bf16.vlgmr.msra.gmra.mrb[0].mxu1 %vm140_vm3, %v137_v28 }
 0x11d   :  { %1647 = vmatprep.mubr.msk.bf16.mxu1 %vm1948_vm0, %v1947_v0 }
 0x12f   :  { %v289_v29 = vpop.f32.mrb[4].mxu0 }
 0x130   :  { %v1643_v30 = vpop.f32.mrb[5].mxu0 }
 0x131   :  { %v292_v33 = vpop.f32.mrb[6].mxu0 }
 0x132   :  { %v296_v34 = vpack.c.bf16 %v292_v33, %v289_v29  ;;  %v1644_v35 = vpop.f32.mrb[7].mxu0  ;;  %v2104_v33 = vld [vmem:[#allocation4 + $0x38] sm:$0xff] }
 0x134   :  { %1646 = vmatpush3.bf16.msra.mxu1 %v296_v34 }
 0x135   :  { %1792 = vmatprep.subr.bf16.mxu1 %v1949_v37 }
 0x137   :  { %1648 = vmatmul.mubr.msk.bf16.vlgmr.msra.gmra.mrb[4].mxu1 %vm297_vm4, %v2042_v36 }
 0x138   :  { %1655 = vmatprep.mubr.msk.f32.mxu1 %vm1948_vm0, %v1947_v0 }
 0x1ef   :  { %v181_v38 = vpop.f32.mrb[0].mxu1 }
 0x1f0   :  { %v1623_v39 = vpop.f32.mrb[1].mxu1  ;;  %v2049_v45 = vadd.f32 %v181_v38, %v64_v42 }
 0x1f1   :  { %v184_v40 = vpop.f32.mrb[2].mxu1 }
 0x1f2   :  { %v1624_v41 = vpop.f32.mrb[3].mxu1  ;;  %v2051_v46 = vadd.f32 %v184_v40, %v65_v43 }
 0x20a   :  { %v335_v44 = vpop.f32.mrb[4].mxu1 }
 0x20b   :  { %v1649_v47 = vpop.f32.mrb[5].mxu1  ;;  %v2054_v49 = vadd.f32 %v335_v44, %v2049_v45 }
 0x20c   :  { %v338_v48 = vpop.f32.mrb[6].mxu1 }
 0x20d   :  { %v2057_v50 = vadd.f32 %v338_v48, %v2051_v46  ;;  %v1650_v51 = vpop.f32.mrb[7].mxu1  ;;  %v416_v54 = vmul.f32 %v2054_v49, %v2054_v49 }
 0x20f   :  { %v1793_v52 = vpack.c.bf16 %v2057_v50, %v2054_v49  ;;  %v417_v53 = vmul.f32 %v2057_v50, %v2057_v50 }
 0x211   :  { %1794 = vmatpush3.bf16.msra.mxu1 %v1793_v52  ;;  %v1796_v56 = vpack.c.bf16 %v417_v53, %v416_v54 }
 0x212   :  { %1795 = vmatprep.subr.bf16.mxu1 %v1949_v37 }
 0x214   :  { %1656 = vmatmul.mubr.msk.f32.vlgmr.msra.gmra.mrb[8].mxu1 %vm297_vm4, %v2065_v55 }
 0x215   :  { %1797 = vmatpush3.bf16.msra.mxu1 %v1796_v56  ;;  %1662 = vmatprep.mubr.msk.f32.mxu1 %vm1948_vm0, %v1947_v0 }
 0x216   :  { %1665 = vmatprep.subr.bf16.mxu1 %v1947_v0 }
 0x218   :  { %1663 = vmatmul.mubr.msk.f32.vlgmr.msra.gmra.mrb[10].mxu1 %vm297_vm4, %v2065_v55 }
 0x219   :  { %1681 = vmatprep.mubr.msk.bf16.mxu1 %vm1948_vm0, %v1947_v0  ;;  %1666 = vmatpush3.bf16.msra.mxu1 %v1832_v57 }
 0x21a   :  { %1667 = vmatprep.subr.bf16.mxu1 %v1947_v0 }
 0x21d   :  { %1668 = vmatpush3.bf16.msra.mxu1 %v1833_v58 }
 0x21e   :  { %1669 = vmatprep.subr.bf16.mxu1 %v1947_v0 }
 0x221   :  { %1670 = vmatpush3.bf16.msra.mxu1 %v1834_v59  ;;  %v1840_v59 = vld [vmem:[#allocation6 + $0x80] sm:$0xff]  }
 0x222   :  { %1671 = vmatprep.subr.bf16.mxu1 %v1947_v0 }
 0x225   :  { %1672 = vmatpush3.bf16.msra.mxu1 %v1835_v60  ;;  %v1841_v60 = vld [vmem:[#allocation6 + $0x88] sm:$0xff]  }
 0x226   :  { %1673 = vmatprep.subr.bf16.mxu1 %v1947_v0 }
 0x229   :  { %1674 = vmatpush3.bf16.msra.mxu1 %v1836_v61  ;;  %v1842_v61 = vld [vmem:[#allocation6 + $0x90] sm:$0xff]  }
 0x22a   :  { %1675 = vmatprep.subr.bf16.mxu1 %v1947_v0 }
 0x22d   :  { %1676 = vmatpush3.bf16.msra.mxu1 %v1837_v62  ;;  %v1843_v62 = vld [vmem:[#allocation6 + $0x98] sm:$0xff]  }
 0x22e   :  { %1677 = vmatprep.subr.bf16.mxu1 %v1947_v0 }
 0x231   :  { %1678 = vmatpush3.bf16.msra.mxu1 %v1838_v63  ;;  %v1844_v63 = vld [vmem:[#allocation6 + $0xa0] sm:$0xff]  }
 0x232   :  { %1679 = vmatprep.subr.bf16.mxu1 %v1947_v0 }
 0x235   :  { %1680 = vmatpush3.bf16.msra.mxu1 %v1839_v1  ;;  %v1845_v1 = vld [vmem:[#allocation6 + $0xa8] sm:$0xff]  }
 0x236   :  { %1725 = vmatprep.subr.bf16.mxu1 %v1947_v0 }
 0x2e7   :  { %v411_v2 = vpop.f32.mrb[8].mxu1 }
 0x2e8   :  { %v415_v3 = vmul.f32 0.07692308, %v411_v2  ;;  %v1657_v4 = vpop.f32.mrb[9].mxu1  ;;  %v1846_v2 = vld [vmem:[#allocation6 + $0xb0] sm:$0xff]  }
 0x2ea   :  { %v489_v6 = vmul.f32 %v415_v3, %v415_v3  ;;  %v495_v15 = vrot.slane %v415_v3, %v2088_v14  ;;  %v1847_v3 = vld [vmem:[#allocation6 + $0xb8] sm:$0xff]  }
 0x2eb   :  { %v484_v5 = vpop.f32.mrb[10].mxu1 }
 0x2ec   :  { %v488_v7 = vmul.f32 0.07692308, %v484_v5  ;;  %v1664_v8 = vpop.f32.mrb[11].mxu1  ;;  %v496_v21 = vsub.f32 %v2054_v49, %v495_v15  ;;  %v497_v22 = vsub.f32 %v2057_v50, %v495_v15 }
 0x2ee   :  { %v490_v9 = vsub.f32 %v488_v7, %v489_v6 }
 0x2f0   :  { %v491_v11 = vmax.f32 %v490_v9, 0.0 }
 0x2f2   :  { %v498_v12 = vadd.f32 1e-05, %v491_v11 }
 0x2f4   :  { %1864 = vrsqrt.f32 %v498_v12 }
 0x2fe   :  { %v1865_v19 = vpop.eup %1864 }
 0x2ff   :  { %v503_v23 = vrot.slane %v1865_v19, %v2088_v14 }
 0x301   :  { %v504_v25 = vmul.f32 %v503_v23, %v496_v21  ;;  %v505_v26 = vmul.f32 %v503_v23, %v497_v22  ;;  %v2145_v21 = vsub.s32 1, %v2085_v13 }
 0x303   :  { %v510_v28 = vmul.f32 %v509_v24, %v504_v25  ;;  %v511_v29 = vmul.f32 %v509_v24, %v505_v26  ;;  %v836_v26 = vrot.slane %v2091_v18, %v2145_v21 }
 0x305   :  { %v516_v30 = vadd.f32 %v515_v27, %v510_v28  ;;  %v517_v31 = vadd.f32 %v515_v27, %v511_v29  ;;  %v842_v29 = vrot.slane %v2093_v20, %v2145_v21 }
 0x307   :  { %v518_v34 = vmax.f32 %v516_v30, 0.0  ;;  %v519_v35 = vmax.f32 %v517_v31, 0.0 }
 0x309   :  { %v520_v38 = vmul.f32 %v518_v34, %v2102_v32  ;;  %v521_v39 = vmul.f32 %v519_v35, %v2104_v33 }
 0x30b   :  { %v2109_v40 = vadd.f32 %v520_v38, %v2027_v16  ;;  %v2112_v41 = vadd.f32 %v521_v39, %v2029_v17 }
 0x30d   :  { %v540_v42 = vpack.c.bf16 %v2112_v41, %v2109_v40 }
 0x30f   :  { %1682 = vmatmul.mubr.bf16.vlgmr.msra.gmra.mrb[12].mxu1 %v540_v42 }
 0x310   :  { %1727 = vmatprep.mubr.msk.bf16.mxu1 %vm1948_vm0, %v1947_v0 }
 0x3e2   :  { %v623_v43 = vpop.f32.mrb[12].mxu1 }
 0x3e3   :  { %v1683_v44 = vpop.f32.mrb[13].mxu1 }
 0x3e4   :  { %v626_v47 = vpop.f32.mrb[14].mxu1 }
 0x3e5   :  { %v630_v48 = vpack.c.bf16 %v626_v47, %v623_v43  ;;  %v1684_v49 = vpop.f32.mrb[15].mxu1 }
 0x3e7   :  { %1686 = vmatpush3.bf16.msra.mxu0 %v630_v48 }
 0x3e8   :  { %1798 = vmatprep.subr.bf16.mxu0 %v1949_v37 }
 0x3ea   :  { %1688 = vmatmul.mubr.msk.bf16.vlgmr.msra.gmra.mrb[8].mxu0 %vm297_vm4, %v2042_v36 }
 0x3eb   :  { %1695 = vmatprep.mubr.msk.f32.mxu0 %vm1948_vm0, %v1947_v0 }
 0x4bd   :  { %v665_v16 = vpop.f32.mrb[8].mxu0 }
 0x4be   :  { %v1689_v17 = vpop.f32.mrb[9].mxu0  ;;  %v666_v51 = vadd.f32 %v665_v16, %v2049_v45 }
 0x4bf   :  { %v668_v50 = vpop.f32.mrb[10].mxu0 }
 0x4c0   :  { %v669_v52 = vadd.f32 %v668_v50, %v2051_v46  ;;  %v1690_v53 = vpop.f32.mrb[11].mxu0  ;;  %v743_v57 = vmul.f32 %v666_v51, %v666_v51 }
 0x4c2   :  { %v1799_v54 = vpack.c.bf16 %v669_v52, %v666_v51  ;;  %v744_v56 = vmul.f32 %v669_v52, %v669_v52 }
 0x4c4   :  { %1800 = vmatpush3.bf16.msra.mxu0 %v1799_v54  ;;  %v1802_v58 = vpack.c.bf16 %v744_v56, %v743_v57 }
 0x4c5   :  { %1801 = vmatprep.subr.bf16.mxu0 %v1949_v37 }
 0x4c7   :  { %1696 = vmatmul.mubr.msk.f32.vlgmr.msra.gmra.mrb[12].mxu0 %vm297_vm4, %v2065_v55 }
 0x4c8   :  { %1803 = vmatpush3.bf16.msra.mxu0 %v1802_v58  ;;  %1702 = vmatprep.mubr.msk.f32.mxu0 %vm1948_vm0, %v1947_v0 }
 0x4c9   :  { %1705 = vmatprep.subr.bf16.mxu0 %v1947_v0 }
 0x4cb   :  { %1703 = vmatmul.mubr.msk.f32.vlgmr.msra.gmra.mrb[14].mxu0 %vm297_vm4, %v2065_v55 }
 0x4cc   :  { %1721 = vmatprep.mubr.msk.bf16.mxu0 %vm1948_vm0, %v1947_v0  ;;  %1706 = vmatpush3.bf16.msra.mxu0 %v1840_v59 }
 0x4cd   :  { %1707 = vmatprep.subr.bf16.mxu0 %v1947_v0 }
 0x4d0   :  { %1708 = vmatpush3.bf16.msra.mxu0 %v1841_v60 }
 0x4d1   :  { %1709 = vmatprep.subr.bf16.mxu0 %v1947_v0 }
 0x4d4   :  { %1710 = vmatpush3.bf16.msra.mxu0 %v1842_v61 }
 0x4d5   :  { %1711 = vmatprep.subr.bf16.mxu0 %v1947_v0 }
 0x4d8   :  { %1712 = vmatpush3.bf16.msra.mxu0 %v1843_v62 }
 0x4d9   :  { %1713 = vmatprep.subr.bf16.mxu0 %v1947_v0 }
 0x4dc   :  { %1714 = vmatpush3.bf16.msra.mxu0 %v1844_v63 }
 0x4dd   :  { %1715 = vmatprep.subr.bf16.mxu0 %v1947_v0 }
 0x4e0   :  { %1716 = vmatpush3.bf16.msra.mxu0 %v1845_v1 }
 0x4e1   :  { %1717 = vmatprep.subr.bf16.mxu0 %v1947_v0 }
 0x4e4   :  { %1718 = vmatpush3.bf16.msra.mxu0 %v1846_v2 }
 0x4e5   :  { %1719 = vmatprep.subr.bf16.mxu0 %v1947_v0 }
 0x4e8   :  { %1720 = vmatpush3.bf16.msra.mxu0 %v1847_v3 }
 0x4e9   :  { %1772 = vmatprep.subr.bf16.mxu0 %v1947_v0 }
 0x59a   :  { %v738_v4 = vpop.f32.mrb[12].mxu0 }
 0x59b   :  { %v742_v5 = vmul.f32 0.07692308, %v738_v4  ;;  %v1697_v6 = vpop.f32.mrb[13].mxu0 }
 0x59d   :  { %v816_v8 = vmul.f32 %v742_v5, %v742_v5  ;;  %v822_v19 = vrot.slane %v742_v5, %v2088_v14 }
 0x59e   :  { %v811_v7 = vpop.f32.mrb[14].mxu0 }
 0x59f   :  { %v815_v9 = vmul.f32 0.07692308, %v811_v7  ;;  %v1704_v10 = vpop.f32.mrb[15].mxu0  ;;  %v823_v23 = vsub.f32 %v666_v51, %v822_v19  ;;  %v824_v24 = vsub.f32 %v669_v52, %v822_v19 }
 0x5a1   :  { %v817_v11 = vsub.f32 %v815_v9, %v816_v8 }
 0x5a3   :  { %v818_v12 = vmax.f32 %v817_v11, 0.0 }
 0x5a5   :  { %v825_v15 = vadd.f32 1e-05, %v818_v12 }
 0x5a7   :  { %1866 = vrsqrt.f32 %v825_v15 }
 0x5b1   :  { %v1867_v22 = vpop.eup %1866 }
 0x5b2   :  { %v830_v25 = vrot.slane %v1867_v22, %v2088_v14 }
 0x5b4   :  { %v831_v27 = vmul.f32 %v830_v25, %v823_v23  ;;  %v832_v28 = vmul.f32 %v830_v25, %v824_v24 }
 0x5b6   :  { %v837_v30 = vmul.f32 %v836_v26, %v831_v27  ;;  %v838_v31 = vmul.f32 %v836_v26, %v832_v28 }
 0x5b8   :  { %v843_v34 = vadd.f32 %v842_v29, %v837_v30  ;;  %v844_v35 = vadd.f32 %v842_v29, %v838_v31  ;;  %v1848_v29 = vld [vmem:[#allocation6 + $0xc8] sm:$0xff]   ;;  %v1851_v30 = vld [vmem:[#allocation6 + $0xe0] sm:$0xff]  }
 0x5b9   :  { %v1852_v31 = vld [vmem:[#allocation6 + $0xe8] sm:$0xff]  }
 0x5ba   :  { %v845_v38 = vmax.f32 %v843_v34, 0.0  ;;  %v846_v39 = vmax.f32 %v844_v35, 0.0  ;;  %v1853_v34 = vld [vmem:[#allocation6 + $0xf0] sm:$0xff]   ;;  %v1854_v35 = vld [vmem:[#allocation6 + $0xf8] sm:$0xff]  }
 0x5bc   :  { %v847_v42 = vmul.f32 %v845_v38, %v2102_v32  ;;  %v848_v43 = vmul.f32 %v846_v39, %v2104_v33  ;;  %v1855_v38 = vld [vmem:[#allocation6 + $0x100] sm:$0xff]   ;;  %v1856_v39 = vld [vmem:[#allocation6 + $0x108] sm:$0xff]  }
 0x5be   :  { %v849_v44 = vadd.f32 %v847_v42, %v2109_v40  ;;  %v850_v47 = vadd.f32 %v848_v43, %v2112_v41  ;;  %v1857_v42 = vld [vmem:[#allocation6 + $0x110] sm:$0xff]   ;;  %v1858_v43 = vld [vmem:[#allocation6 + $0x118] sm:$0xff]  }
 0x5c0   :  { %v867_v48 = vpack.c.bf16 %v850_v47, %v849_v44 }
 0x5c2   :  { %1722 = vmatmul.mubr.bf16.vlgmr.msra.gmra.mrb[16].mxu0 %v867_v48  ;;  %v1861_v48 = vld [vmem:[#allocation6 + $0x130] sm:$0xff]  }
 0x5c3   :  { %1788 = vmatprep.mubr.msk.bf16.mxu0 %vm1948_vm0, %v1947_v0  ;;  %1773 = vmatpush3.bf16.msra.mxu0 %v1856_v39 }
 0x5c4   :  { %1774 = vmatprep.subr.bf16.mxu0 %v1947_v0 }
 0x5c7   :  { %1775 = vmatpush3.bf16.msra.mxu0 %v1857_v42 }
 0x5c8   :  { %1776 = vmatprep.subr.bf16.mxu0 %v1947_v0 }
 0x5cb   :  { %1777 = vmatpush3.bf16.msra.mxu0 %v1858_v43 }
 0x5cc   :  { %1778 = vmatprep.subr.bf16.mxu0 %v1947_v0 }
 0x695   :  { %v950_v49 = vpop.f32.mrb[16].mxu0 }
 0x696   :  { %v1723_v16 = vpop.f32.mrb[17].mxu0 }
 0x697   :  { %v953_v17 = vpop.f32.mrb[18].mxu0 }
 0x698   :  { %v957_v50 = vpack.c.bf16 %v953_v17, %v950_v49  ;;  %v1724_v51 = vpop.f32.mrb[19].mxu0 }
 0x699   :  { %v1863_v51 = vld [vmem:[#allocation6 + $0x140] sm:$0xff]  }
 0x69a   :  { %1726 = vmatpush3.bf16.msra.mxu1 %v957_v50  ;;  %v1862_v50 = vld [vmem:[#allocation6 + $0x138] sm:$0xff]  }
 0x69b   :  { %1804 = vmatprep.subr.bf16.mxu1 %v1949_v37 }
 0x69d   :  { %1728 = vmatmul.mubr.msk.bf16.vlgmr.msra.gmra.mrb[16].mxu1 %vm297_vm4, %v2042_v36 }
 0x69e   :  { %1735 = vmatprep.mubr.msk.f32.mxu1 %vm1948_vm0, %v1947_v0 }
 0x770   :  { %v992_v40 = vpop.f32.mrb[16].mxu1 }
 0x771   :  { %v1729_v41 = vpop.f32.mrb[17].mxu1  ;;  %v993_v53 = vadd.f32 %v992_v40, %v2049_v45  ;;  %v68_v40 = vld [vmem:[#allocation4 + $0x60] sm:$0xff] }
 0x772   :  { %v995_v52 = vpop.f32.mrb[18].mxu1  ;;  %v1290_v41 = vrot.slane %v68_v40, %v2088_v14 }
 0x773   :  { %v996_v54 = vadd.f32 %v995_v52, %v2051_v46  ;;  %v1730_v56 = vpop.f32.mrb[19].mxu1  ;;  %v1070_v59 = vmul.f32 %v993_v53, %v993_v53 }
 0x775   :  { %v1805_v57 = vpack.c.bf16 %v996_v54, %v993_v53  ;;  %v1071_v58 = vmul.f32 %v996_v54, %v996_v54 }
 0x777   :  { %1806 = vmatpush3.bf16.msra.mxu1 %v1805_v57  ;;  %v1808_v60 = vpack.c.bf16 %v1071_v58, %v1070_v59 }
 0x778   :  { %1807 = vmatprep.subr.bf16.mxu1 %v1949_v37 }
 0x77a   :  { %1736 = vmatmul.mubr.msk.f32.vlgmr.msra.gmra.mrb[20].mxu1 %vm297_vm4, %v2065_v55 }
 0x77b   :  { %1809 = vmatpush3.bf16.msra.mxu1 %v1808_v60  ;;  %1742 = vmatprep.mubr.msk.f32.mxu1 %vm1948_vm0, %v1947_v0  ;;  %v1384_v60 = vrot.slane %v68_v40, %v2145_v21 }
 0x77c   :  { %1810 = vmatprep.subr.bf16.mxu1 %v1949_v37  ;;  %v1162_v37 = vsub.s32 2, %v2085_v13 }
 0x77e   :  { %1743 = vmatmul.mubr.msk.f32.vlgmr.msra.gmra.mrb[22].mxu1 %vm297_vm4, %v2065_v55  ;;  %v1163_v9 = vrot.slane %v2091_v18, %v1162_v37  ;;  %v1169_v12 = vrot.slane %v2093_v20, %v1162_v37  ;;  %v60_v20 = vld [vmem:[#allocation4 + $0x20] sm:$0xff] }
 0x77f   :  { %1749 = vmatprep.mubr.msk.f32.mxu1 %vm1948_vm0, %v1947_v0 }
 0x84d   :  { %v1065_v36 = vpop.f32.mrb[20].mxu1 }
 0x84e   :  { %v1069_v45 = vmul.f32 0.07692308, %v1065_v36  ;;  %v1737_v46 = vpop.f32.mrb[21].mxu1 }
 0x850   :  { %v1143_v62 = vmul.f32 %v1069_v45, %v1069_v45  ;;  %v1149_v5 = vrot.slane %v1069_v45, %v2088_v14 }
 0x851   :  { %v1138_v61 = vpop.f32.mrb[22].mxu1 }
 0x852   :  { %v1142_v63 = vmul.f32 0.07692308, %v1138_v61  ;;  %v1744_v1 = vpop.f32.mrb[23].mxu1  ;;  %v1150_v55 = vsub.f32 %v993_v53, %v1149_v5  ;;  %v1151_v7 = vsub.f32 %v996_v54, %v1149_v5 }
 0x854   :  { %v1144_v2 = vsub.f32 %v1142_v63, %v1143_v62 }
 0x856   :  { %v1145_v3 = vmax.f32 %v1144_v2, 0.0 }
 0x858   :  { %v1152_v4 = vadd.f32 1e-05, %v1145_v3 }
 0x85a   :  { %1868 = vrsqrt.f32 %v1152_v4 }
 0x864   :  { %v1869_v6 = vpop.eup %1868 }
 0x865   :  { %v1157_v8 = vrot.slane %v1869_v6, %v2088_v14 }
 0x867   :  { %v1158_v10 = vmul.f32 %v1157_v8, %v1150_v55  ;;  %v1159_v11 = vmul.f32 %v1157_v8, %v1151_v7 }
 0x869   :  { %v1164_v15 = vmul.f32 %v1163_v9, %v1158_v10  ;;  %v1165_v19 = vmul.f32 %v1163_v9, %v1159_v11 }
 0x86b   :  { %v1170_v22 = vadd.f32 %v1169_v12, %v1164_v15  ;;  %v1171_v23 = vadd.f32 %v1169_v12, %v1165_v19 }
 0x86d   :  { %v1172_v24 = vmax.f32 %v1170_v22, 0.0  ;;  %v1173_v25 = vmax.f32 %v1171_v23, 0.0 }
 0x86f   :  { %v1174_v26 = vmul.f32 %v1172_v24, %v2102_v32  ;;  %v1175_v13 = vmul.f32 %v1173_v25, %v2104_v33  ;;  %v1849_v32 = vld [vmem:[#allocation6 + $0xd0] sm:$0xff]   ;;  %v1850_v33 = vld [vmem:[#allocation6 + $0xd8] sm:$0xff]  }
 0x871   :  { %v1176_v27 = vadd.f32 %v1174_v26, %v849_v44  ;;  %v1177_v28 = vadd.f32 %v1175_v13, %v850_v47  ;;  %v1859_v44 = vld [vmem:[#allocation6 + $0x120] sm:$0xff]   ;;  %v1860_v47 = vld [vmem:[#allocation6 + $0x128] sm:$0xff]  }
 0x872   :  { %1779 = vmatpush3.bf16.msra.mxu0 %v1859_v44 }
 0x873   :  { %1178 = vst [vmem:[%s2217_s3] sm:$0xff] %v1176_v27  ;;  %1179 = vst [vmem:[%s2217_s3 + $0x8] sm:$0xff] %v1177_v28  ;;  %v1811_v18 = vpack.c.bf16 %v1177_v28, %v1176_v27  ;;  %1780 = vmatprep.subr.bf16.mxu0 %v1947_v0 }
 0x875   :  { %1812 = vmatpush3.bf16.msra.mxu1 %v1811_v18 }
 0x876   :  { %1752 = vmatprep.subr.bf16.mxu1 %v1947_v0  ;;  %1781 = vmatpush3.bf16.msra.mxu0 %v1860_v47 }
 0x877   :  { %1782 = vmatprep.subr.bf16.mxu0 %v1947_v0 }
 0x878   :  { %1750 = vmatmul.mubr.msk.f32.vlgmr.msra.gmra.mrb[24].mxu1 %vm297_vm4, %v60_v20 }
 0x879   :  { %1753 = vmatpush3.bf16.msra.mxu1 %v1848_v29  ;;  %1768 = vmatprep.mubr.msk.bf16.mxu1 %vm1948_vm0, %v1947_v0 }
 0x87a   :  { %1754 = vmatprep.subr.bf16.mxu1 %v1947_v0  ;;  %1783 = vmatpush3.bf16.msra.mxu0 %v1861_v48 }
 0x87b   :  { %1784 = vmatprep.subr.bf16.mxu0 %v1947_v0 }
 0x87d   :  { %1755 = vmatpush3.bf16.msra.mxu1 %v1849_v32 }
 0x87e   :  { %1756 = vmatprep.subr.bf16.mxu1 %v1947_v0  ;;  %1785 = vmatpush3.bf16.msra.mxu0 %v1862_v50 }
 0x87f   :  { %1786 = vmatprep.subr.bf16.mxu0 %v1947_v0 }
 0x881   :  { %1757 = vmatpush3.bf16.msra.mxu1 %v1850_v33 }
 0x882   :  { %1758 = vmatprep.subr.bf16.mxu1 %v1947_v0  ;;  %1787 = vmatpush3.bf16.msra.mxu0 %v1863_v51 }
 0x885   :  { %1759 = vmatpush3.bf16.msra.mxu1 %v1851_v30 }
 0x886   :  { %1760 = vmatprep.subr.bf16.mxu1 %v1947_v0 }
 0x889   :  { %1761 = vmatpush3.bf16.msra.mxu1 %v1852_v31 }
 0x88a   :  { %1762 = vmatprep.subr.bf16.mxu1 %v1947_v0 }
 0x88d   :  { %1763 = vmatpush3.bf16.msra.mxu1 %v1853_v34 }
 0x88e   :  { %1764 = vmatprep.subr.bf16.mxu1 %v1947_v0 }
 0x891   :  { %1765 = vmatpush3.bf16.msra.mxu1 %v1854_v35 }
 0x892   :  { %1766 = vmatprep.subr.bf16.mxu1 %v1947_v0 }
 0x895   :  { %1767 = vmatpush3.bf16.msra.mxu1 %v1855_v38 }
 0x94b   :  { %v1249_v49 = vpop.f32.mrb[24].mxu1 }
 0x94c   :  { %1253 = vst [vmem:[%s2217_s3 + $0x10] sm:$0xff] %v1249_v49  ;;  %v1286_v16 = vpack.c.bf16 %v1249_v49, %v1249_v49  ;;  %v1751_v17 = vpop.f32.mrb[25].mxu1 }
 0x94e   :  { %1769 = vmatmul.mubr.bf16.vlgmr.msra.gmra.mrb[28].mxu1 %v1286_v16 }
 0xa21   :  { %v1373_v52 = vpop.f32.mrb[28].mxu1 }
 0xa22   :  { %v1374_v53 = vadd.f32 %v1373_v52, %v1290_v41  ;;  %v1770_v54 = vpop.f32.mrb[29].mxu1 }
 0xa23   :  { %v1376_v56 = vpop.f32.mrb[30].mxu1 }
 0xa24   :  { %v1379_v57 = vmax.f32 %v1374_v53, 0.0  ;;  %v1771_v58 = vpop.f32.mrb[31].mxu1 }
 0xa26   :  { %v1380_v59 = vpack.c.bf16 %v1379_v57, %v1379_v57 }
 0xa28   :  { %1789 = vmatmul.mubr.bf16.vlgmr.msra.gmra.mrb[20].mxu0 %v1380_v59 }
 0xafb   :  { %v1467_v36 = vpop.f32.mrb[20].mxu0 }
 0xafc   :  { %v1468_v45 = vadd.f32 %v1467_v36, %v1384_v60  ;;  %v1790_v46 = vpop.f32.mrb[21].mxu0 }
 0xafd   :  { %v1470_v61 = vpop.f32.mrb[22].mxu0 }
 0xafe   :  { %1473 = vst [vmem:[%s2217_s3 + $0x18] sm:$0xff] %v1468_v45  ;;  %v1791_v0 = vpop.f32.mrb[23].mxu0 }
 0xaff   :  { %1478 = vsyncpa [#allocation3], 1 }
 0xb00   :  { %1479 = vsyncpa [#allocation5], 1 }

</bundles_post_ra>
